<compile_context>
chip_gen: v6e
topology: v6e:2x2x1
jax: 0.10.0
libtpu: 0.0.40
codegen_flags: <defaults>
</compile_context>

<pallas_src>
import functools

import jax
import jax.numpy as jnp
from jax.experimental import pallas as pl
from jax.experimental.pallas import tpu as pltpu

LEAKY_SLOPE = 0.01  # nn.LeakyReLU default negative_slope


def _leaky_relu(x):
    return jnp.where(x >= 0, x, LEAKY_SLOPE * x)


def cluster_weighter_kernel(
    mu_ref,    # (TN, F)
    var_ref,   # (TN, F)
    occ_ref,   # (TN, 1)
    w1m_ref,   # (F, 4F)  slice of W1 acting on mu
    w1v_ref,   # (F, 4F)  slice of W1 acting on var
    w1o_ref,   # (1, 4F)  slice of W1 acting on occupancy
    b1_ref,    # (1, 4F)
    w2_ref, b2_ref,   # (4F, F), (1, F)
    w3_ref, b3_ref,   # (F, F),  (1, F)
    w4_ref,    # (1, F)   final layer weights as a row vector
    b4_ref,    # (1, 1)
    o_ref,     # (TN, 1)
):
    occ = occ_ref[...]  # (TN, 1)

    # Layer 1: the torch.cat is fused away -> two MXU matmuls plus a VPU
    # broadcast multiply for the occupancy column.
    h = jnp.dot(mu_ref[...], w1m_ref[...], preferred_element_type=jnp.float32)
    h = h + jnp.dot(var_ref[...], w1v_ref[...],
                    preferred_element_type=jnp.float32)
    h = h + occ * w1o_ref[...] + b1_ref[...]
    h = _leaky_relu(h)

    h = jnp.dot(h, w2_ref[...], preferred_element_type=jnp.float32) + b2_ref[...]
    h = _leaky_relu(h)
    h = jnp.dot(h, w3_ref[...], preferred_element_type=jnp.float32) + b3_ref[...]
    h = _leaky_relu(h)

    # Final Linear(F, 1): VPU multiply + lane-axis sum (avoids an N=1 MXU pass).
    logits = jnp.sum(h * w4_ref[...], axis=-1, keepdims=True) + b4_ref[...]

    # sigmoid(mlp(x)[:, 0] + occupancy[:, 0])
    o_ref[...] = jax.nn.sigmoid(logits + occ).astype(o_ref.dtype)


def _round_up(x, m):
    return (x + m - 1) // m * m


def _choose_tile_rows(n, f, max_tile_rows, vmem_budget_bytes=24 << 20):
    # Small inputs: one full-array block (no padding, no ragged tail, 1 step).
    if n <= 512:
        return n
    # Rough per-row VMEM bytes: mu/var/occ (double-buffered) plus the f32
    # intermediates for the widest (4F) and narrower (F) layers.
    per_row_bytes = 4 * (2 * (2 * f + 1)  # mu + var + occ, x2 pipeline buffers
                         + 4 * f          # layer-1 activation
                         + 2 * f          # layer-2/3 activations + slack
                         + 4)
    vmem_cap = max(256, (vmem_budget_bytes // per_row_bytes) // 128 * 128)
    # 128-aligned tile, capped so the parallel grid has >= 2 steps (keeps both
    # v7x TensorCores busy); ragged last block is handled by Pallas masking.
    return min(max_tile_rows, vmem_cap, _round_up(pl.cdiv(n, 2), 128))


def init_cluster_weighter_params(num_features, key):
    """Deterministic synthetic params. Linear(in, out) -> W:[in,out], b:[1,out]."""
    f = num_features
    dims = [(2 * f + 1, 4 * f), (4 * f, f), (f, f), (f, 1)]
    params = []
    for i, (din, dout) in enumerate(dims):
        kw, kb, key = jax.random.split(jax.random.fold_in(key, i), 3)
        scale = 1.0 / jnp.sqrt(jnp.float32(din))
        w = jax.random.uniform(kw, (din, dout), jnp.float32, -scale, scale)
        b = jax.random.uniform(kb, (1, dout), jnp.float32, -scale, scale)
        params.append((w, b))
    return params


@functools.partial(jax.jit, static_argnames=("num_features", "max_tile_rows"))
def cluster_weighter_forward(mu, var, occupancy, params, *, num_features,
                             max_tile_rows=4096):
    f = num_features
    flatten_components = mu.ndim == 3
    if flatten_components:
        height, num_components, nf = mu.shape
        assert nf == f
        mu = mu.reshape(height * num_components, f)
        var = var.reshape(height * num_components, f)
    n = mu.shape[0]
    occupancy = occupancy.reshape(n, 1)

    mu = mu.astype(jnp.float32)
    var = var.astype(jnp.float32)
    occ = occupancy.astype(jnp.float32)

    (w1, b1), (w2, b2), (w3, b3), (w4, b4) = params
    # Split W1 so torch.cat([mu, var, occupancy]) never materializes:
    #   concat(x) @ W1 == mu @ W1[:F] + var @ W1[F:2F] + occ * W1[2F:2F+1]
    w1 = w1.astype(jnp.float32)
    w1_mu = w1[:f]
    w1_var = w1[f:2 * f]
    w1_occ = w1[2 * f:2 * f + 1]
    w4_row = w4.astype(jnp.float32).reshape(1, f)  # (F,1) -> (1,F) row vector

    weights = (
        w1_mu, w1_var, w1_occ, b1.astype(jnp.float32),
        w2.astype(jnp.float32), b2.astype(jnp.float32),
        w3.astype(jnp.float32), b3.astype(jnp.float32),
        w4_row, b4.astype(jnp.float32),
    )

    tile_n = _choose_tile_rows(n, f, max_tile_rows)
    grid = (pl.cdiv(n, tile_n),)

    row_spec = lambda cols: pl.BlockSpec((tile_n, cols), lambda i: (i, 0))
    # Constant index_map -> weight tiles stay resident in VMEM across steps.
    full_spec = lambda a: pl.BlockSpec(a.shape, lambda i: (0, 0))

    out = pl.pallas_call(
        cluster_weighter_kernel,
        out_shape=jax.ShapeDtypeStruct((n, 1), jnp.float32),
        grid_spec=pltpu.PrefetchScalarGridSpec(
            num_scalar_prefetch=0,
            grid=grid,
            in_specs=[row_spec(f), row_spec(f), row_spec(1)]
                     + [full_spec(w) for w in weights],
            out_specs=row_spec(1),
        ),
        compiler_params=pltpu.CompilerParams(
            dimension_semantics=("parallel",)),
    )(mu, var, occ, *weights)

    result = out[:, 0]
    if flatten_components:
        result = result.reshape(height, num_components)
    return result


def _reference_forward(mu, var, occupancy, params, num_features):
    """Pure-JAX reference mirroring the PyTorch module."""
    flatten_components = mu.ndim == 3
    if flatten_components:
        h, c, f = mu.shape
        mu = mu.reshape(h * c, f)
        var = var.reshape(h * c, f)
        occupancy = occupancy.reshape(h * c, 1)
    x = jnp.concatenate([mu, var, occupancy], axis=1)
    for i, (w, b) in enumerate(params):
        x = x @ w + b
        if i < 3:
            x = jnp.where(x >= 0, x, LEAKY_SLOPE * x)
    y = jax.nn.sigmoid(x[:, 0] + occupancy[:, 0])
    if flatten_components:
        y = y.reshape(h, c)
    return y


if __name__ == "__main__":
    num_features = 16
    height, num_components = 8, 16   # rows = 128

    key = jax.random.PRNGKey(0)
    k_mu, k_var, k_occ, k_params = jax.random.split(key, 4)

    mu = jax.random.normal(k_mu, (height, num_components, num_features),
                           jnp.float32)
    var = jax.random.uniform(k_var, (height, num_components, num_features),
                             jnp.float32, 0.1, 1.0)
    occupancy = jax.random.uniform(k_occ, (height, num_components), jnp.float32)

    params = init_cluster_weighter_params(num_features, k_params)

    out = cluster_weighter_forward(mu, var, occupancy, params,
                                   num_features=num_features)
    out = jax.block_until_ready(out)

    ref = _reference_forward(mu, var, occupancy, params, num_features)
    assert out.shape == (height, num_components), out.shape
    assert jnp.allclose(out, ref, atol=1e-5, rtol=1e-5), \
        float(jnp.max(jnp.abs(out - ref)))

    print("KERNEL_OK")
</pallas_src>

<mosaic_0001>
module attributes {stable_mosaic.version = 11 : i64} {
  func.func @cluster_weighter_kernel(%arg0: i32, %arg1: memref<128x16xf32, #tpu.memory_space<vmem>>, %arg2: memref<128x16xf32, #tpu.memory_space<vmem>>, %arg3: memref<128x1xf32, #tpu.memory_space<vmem>>, %arg4: memref<16x64xf32, #tpu.memory_space<vmem>>, %arg5: memref<16x64xf32, #tpu.memory_space<vmem>>, %arg6: memref<1x64xf32, #tpu.memory_space<vmem>>, %arg7: memref<1x64xf32, #tpu.memory_space<vmem>>, %arg8: memref<64x16xf32, #tpu.memory_space<vmem>>, %arg9: memref<1x16xf32, #tpu.memory_space<vmem>>, %arg10: memref<16x16xf32, #tpu.memory_space<vmem>>, %arg11: memref<1x16xf32, #tpu.memory_space<vmem>>, %arg12: memref<1x16xf32, #tpu.memory_space<vmem>>, %arg13: memref<1x1xf32, #tpu.memory_space<vmem>>, %arg14: memref<128x1xf32, #tpu.memory_space<vmem>>) attributes {dimension_semantics = [#tpu.dimension_semantics<parallel>], iteration_bounds = array<i64: 1>, scalar_prefetch = 0 : i64, scratch_operands = 0 : i64, tpu.core_type = #tpu.core_type<tc>, window_params = [{transform_indices = @transform_0, window_bounds = array<i64: 128, 16>}, {transform_indices = @transform_1, window_bounds = array<i64: 128, 16>}, {transform_indices = @transform_2, window_bounds = array<i64: 128, 1>}, {pipeline_mode = #tpu.pipeline_mode<synchronous>, transform_indices = @transform_3, window_bounds = array<i64: 16, 64>}, {pipeline_mode = #tpu.pipeline_mode<synchronous>, transform_indices = @transform_4, window_bounds = array<i64: 16, 64>}, {pipeline_mode = #tpu.pipeline_mode<synchronous>, transform_indices = @transform_5, window_bounds = array<i64: 1, 64>}, {pipeline_mode = #tpu.pipeline_mode<synchronous>, transform_indices = @transform_6, window_bounds = array<i64: 1, 64>}, {pipeline_mode = #tpu.pipeline_mode<synchronous>, transform_indices = @transform_7, window_bounds = array<i64: 64, 16>}, {pipeline_mode = #tpu.pipeline_mode<synchronous>, transform_indices = @transform_8, window_bounds = array<i64: 1, 16>}, {pipeline_mode = #tpu.pipeline_mode<synchronous>, transform_indices = @transform_9, window_bounds = array<i64: 16, 16>}, {pipeline_mode = #tpu.pipeline_mode<synchronous>, transform_indices = @transform_10, window_bounds = array<i64: 1, 16>}, {pipeline_mode = #tpu.pipeline_mode<synchronous>, transform_indices = @transform_11, window_bounds = array<i64: 1, 16>}, {pipeline_mode = #tpu.pipeline_mode<synchronous>, transform_indices = @transform_12, window_bounds = array<i64: 1, 1>}, {transform_indices = @transform_13, window_bounds = array<i64: 128, 1>}]} {
    %c0 = arith.constant 0 : index
    %c0_0 = arith.constant 0 : index
    %0 = vector.load %arg3[%c0, %c0_0] : memref<128x1xf32, #tpu.memory_space<vmem>>, vector<128x1xf32>
    %c0_1 = arith.constant 0 : index
    %c0_2 = arith.constant 0 : index
    %1 = vector.load %arg1[%c0_1, %c0_2] : memref<128x16xf32, #tpu.memory_space<vmem>>, vector<128x16xf32>
    %c0_3 = arith.constant 0 : index
    %c0_4 = arith.constant 0 : index
    %2 = vector.load %arg4[%c0_3, %c0_4] : memref<16x64xf32, #tpu.memory_space<vmem>>, vector<16x64xf32>
    %cst = arith.constant dense<0.000000e+00> : vector<128x64xf32>
    %3 = tpu.matmul %1, %2, %cst {dimension_numbers = #tpu.dot_dimension_numbers<[1], [0], [0], [1], [0, 0, 1, 1], [], []>} : vector<128x16xf32>, vector<16x64xf32>, vector<128x64xf32> -> vector<128x64xf32>
    %c0_5 = arith.constant 0 : index
    %c0_6 = arith.constant 0 : index
    %4 = vector.load %arg2[%c0_5, %c0_6] : memref<128x16xf32, #tpu.memory_space<vmem>>, vector<128x16xf32>
    %c0_7 = arith.constant 0 : index
    %c0_8 = arith.constant 0 : index
    %5 = vector.load %arg5[%c0_7, %c0_8] : memref<16x64xf32, #tpu.memory_space<vmem>>, vector<16x64xf32>
    %cst_9 = arith.constant dense<0.000000e+00> : vector<128x64xf32>
    %6 = tpu.matmul %4, %5, %cst_9 {dimension_numbers = #tpu.dot_dimension_numbers<[1], [0], [0], [1], [0, 0, 1, 1], [], []>} : vector<128x16xf32>, vector<16x64xf32>, vector<128x64xf32> -> vector<128x64xf32>
    %7 = arith.addf %3, %6 : vector<128x64xf32>
    %c0_10 = arith.constant 0 : index
    %c0_11 = arith.constant 0 : index
    %8 = vector.load %arg6[%c0_10, %c0_11] : memref<1x64xf32, #tpu.memory_space<vmem>>, vector<1x64xf32>
    %9 = vector.broadcast %0 : vector<128x1xf32> to vector<128x64xf32>
    %10 = vector.broadcast %8 : vector<1x64xf32> to vector<128x64xf32>
    %11 = arith.mulf %9, %10 : vector<128x64xf32>
    %12 = arith.addf %7, %11 : vector<128x64xf32>
    %c0_12 = arith.constant 0 : index
    %c0_13 = arith.constant 0 : index
    %13 = vector.load %arg7[%c0_12, %c0_13] : memref<1x64xf32, #tpu.memory_space<vmem>>, vector<1x64xf32>
    %14 = vector.broadcast %13 : vector<1x64xf32> to vector<128x64xf32>
    %15 = arith.addf %12, %14 : vector<128x64xf32>
    %cst_14 = arith.constant 0.000000e+00 : f32
    %16 = vector.broadcast %cst_14 : f32 to vector<128x64xf32>
    %17 = arith.cmpf oge, %15, %16 : vector<128x64xf32>
    %cst_15 = arith.constant 0.00999999977 : f32
    %18 = vector.broadcast %cst_15 : f32 to vector<128x64xf32>
    %19 = arith.mulf %18, %15 : vector<128x64xf32>
    %20 = arith.select %17, %15, %19 : vector<128x64xi1>, vector<128x64xf32>
    %c0_16 = arith.constant 0 : index
    %c0_17 = arith.constant 0 : index
    %21 = vector.load %arg8[%c0_16, %c0_17] : memref<64x16xf32, #tpu.memory_space<vmem>>, vector<64x16xf32>
    %cst_18 = arith.constant dense<0.000000e+00> : vector<128x16xf32>
    %22 = tpu.matmul %20, %21, %cst_18 {dimension_numbers = #tpu.dot_dimension_numbers<[1], [0], [0], [1], [0, 0, 1, 1], [], []>} : vector<128x64xf32>, vector<64x16xf32>, vector<128x16xf32> -> vector<128x16xf32>
    %c0_19 = arith.constant 0 : index
    %c0_20 = arith.constant 0 : index
    %23 = vector.load %arg9[%c0_19, %c0_20] : memref<1x16xf32, #tpu.memory_space<vmem>>, vector<1x16xf32>
    %24 = vector.broadcast %23 : vector<1x16xf32> to vector<128x16xf32>
    %25 = arith.addf %22, %24 : vector<128x16xf32>
    %cst_21 = arith.constant 0.000000e+00 : f32
    %26 = vector.broadcast %cst_21 : f32 to vector<128x16xf32>
    %27 = arith.cmpf oge, %25, %26 : vector<128x16xf32>
    %cst_22 = arith.constant 0.00999999977 : f32
    %28 = vector.broadcast %cst_22 : f32 to vector<128x16xf32>
    %29 = arith.mulf %28, %25 : vector<128x16xf32>
    %30 = arith.select %27, %25, %29 : vector<128x16xi1>, vector<128x16xf32>
    %c0_23 = arith.constant 0 : index
    %c0_24 = arith.constant 0 : index
    %31 = vector.load %arg10[%c0_23, %c0_24] : memref<16x16xf32, #tpu.memory_space<vmem>>, vector<16x16xf32>
    %cst_25 = arith.constant dense<0.000000e+00> : vector<128x16xf32>
    %32 = tpu.matmul %30, %31, %cst_25 {dimension_numbers = #tpu.dot_dimension_numbers<[1], [0], [0], [1], [0, 0, 1, 1], [], []>} : vector<128x16xf32>, vector<16x16xf32>, vector<128x16xf32> -> vector<128x16xf32>
    %c0_26 = arith.constant 0 : index
    %c0_27 = arith.constant 0 : index
    %33 = vector.load %arg11[%c0_26, %c0_27] : memref<1x16xf32, #tpu.memory_space<vmem>>, vector<1x16xf32>
    %34 = vector.broadcast %33 : vector<1x16xf32> to vector<128x16xf32>
    %35 = arith.addf %32, %34 : vector<128x16xf32>
    %cst_28 = arith.constant 0.000000e+00 : f32
    %36 = vector.broadcast %cst_28 : f32 to vector<128x16xf32>
    %37 = arith.cmpf oge, %35, %36 : vector<128x16xf32>
    %cst_29 = arith.constant 0.00999999977 : f32
    %38 = vector.broadcast %cst_29 : f32 to vector<128x16xf32>
    %39 = arith.mulf %38, %35 : vector<128x16xf32>
    %40 = arith.select %37, %35, %39 : vector<128x16xi1>, vector<128x16xf32>
    %c0_30 = arith.constant 0 : index
    %c0_31 = arith.constant 0 : index
    %41 = vector.load %arg12[%c0_30, %c0_31] : memref<1x16xf32, #tpu.memory_space<vmem>>, vector<1x16xf32>
    %42 = vector.broadcast %41 : vector<1x16xf32> to vector<128x16xf32>
    %43 = arith.mulf %40, %42 : vector<128x16xf32>
    %cst_32 = arith.constant dense<0.000000e+00> : vector<128xf32>
    %44 = vector.multi_reduction <add>, %43, %cst_32 [1] : vector<128x16xf32> to vector<128xf32>
    %45 = vector.shape_cast %44 : vector<128xf32> to vector<128x1xf32>
    %c0_33 = arith.constant 0 : index
    %c0_34 = arith.constant 0 : index
    %46 = vector.load %arg13[%c0_33, %c0_34] : memref<1x1xf32, #tpu.memory_space<vmem>>, vector<1x1xf32>
    %47 = vector.broadcast %46 : vector<1x1xf32> to vector<128x1xf32>
    %48 = arith.addf %45, %47 : vector<128x1xf32>
    %49 = arith.addf %48, %0 : vector<128x1xf32>
    %50 = arith.negf %49 : vector<128x1xf32>
    %51 = math.exp %50 : vector<128x1xf32>
    %cst_35 = arith.constant 1.000000e+00 : f32
    %52 = vector.broadcast %cst_35 : f32 to vector<128x1xf32>
    %53 = arith.addf %52, %51 : vector<128x1xf32>
    %54 = arith.divf %52, %53 : vector<128x1xf32>
    %c0_36 = arith.constant 0 : index
    %c0_37 = arith.constant 0 : index
    %55 = vector.load %arg14[%c0_36, %c0_37] : memref<128x1xf32, #tpu.memory_space<vmem>>, vector<128x1xf32>
    tpu.vector_store %arg14[%c0_36, %c0_37], %54 {strides = array<i32>} : memref<128x1xf32, #tpu.memory_space<vmem>>, vector<128x1xf32>,
    return
  }
  func.func @transform_0(%arg0: i32) -> (i32, i32) {
    %c0_i32 = arith.constant 0 : i32
    %c0_i32_0 = arith.constant 0 : i32
    return %arg0, %c0_i32 : i32, i32
  }
  func.func @transform_1(%arg0: i32) -> (i32, i32) {
    %c0_i32 = arith.constant 0 : i32
    %c0_i32_0 = arith.constant 0 : i32
    return %arg0, %c0_i32 : i32, i32
  }
  func.func @transform_2(%arg0: i32) -> (i32, i32) {
    %c0_i32 = arith.constant 0 : i32
    %c0_i32_0 = arith.constant 0 : i32
    return %arg0, %c0_i32 : i32, i32
  }
  func.func @transform_3(%arg0: i32) -> (i32, i32) {
    %c0_i32 = arith.constant 0 : i32
    %c0_i32_0 = arith.constant 0 : i32
    %c0_i32_1 = arith.constant 0 : i32
    return %c0_i32, %c0_i32_0 : i32, i32
  }
  func.func @transform_4(%arg0: i32) -> (i32, i32) {
    %c0_i32 = arith.constant 0 : i32
    %c0_i32_0 = arith.constant 0 : i32
    %c0_i32_1 = arith.constant 0 : i32
    return %c0_i32, %c0_i32_0 : i32, i32
  }
  func.func @transform_5(%arg0: i32) -> (i32, i32) {
    %c0_i32 = arith.constant 0 : i32
    %c0_i32_0 = arith.constant 0 : i32
    %c0_i32_1 = arith.constant 0 : i32
    return %c0_i32, %c0_i32_0 : i32, i32
  }
  func.func @transform_6(%arg0: i32) -> (i32, i32) {
    %c0_i32 = arith.constant 0 : i32
    %c0_i32_0 = arith.constant 0 : i32
    %c0_i32_1 = arith.constant 0 : i32
    return %c0_i32, %c0_i32_0 : i32, i32
  }
  func.func @transform_7(%arg0: i32) -> (i32, i32) {
    %c0_i32 = arith.constant 0 : i32
    %c0_i32_0 = arith.constant 0 : i32
    %c0_i32_1 = arith.constant 0 : i32
    return %c0_i32, %c0_i32_0 : i32, i32
  }
  func.func @transform_8(%arg0: i32) -> (i32, i32) {
    %c0_i32 = arith.constant 0 : i32
    %c0_i32_0 = arith.constant 0 : i32
    %c0_i32_1 = arith.constant 0 : i32
    return %c0_i32, %c0_i32_0 : i32, i32
  }
  func.func @transform_9(%arg0: i32) -> (i32, i32) {
    %c0_i32 = arith.constant 0 : i32
    %c0_i32_0 = arith.constant 0 : i32
    %c0_i32_1 = arith.constant 0 : i32
    return %c0_i32, %c0_i32_0 : i32, i32
  }
  func.func @transform_10(%arg0: i32) -> (i32, i32) {
    %c0_i32 = arith.constant 0 : i32
    %c0_i32_0 = arith.constant 0 : i32
    %c0_i32_1 = arith.constant 0 : i32
    return %c0_i32, %c0_i32_0 : i32, i32
  }
  func.func @transform_11(%arg0: i32) -> (i32, i32) {
    %c0_i32 = arith.constant 0 : i32
    %c0_i32_0 = arith.constant 0 : i32
    %c0_i32_1 = arith.constant 0 : i32
    return %c0_i32, %c0_i32_0 : i32, i32
  }
  func.func @transform_12(%arg0: i32) -> (i32, i32) {
    %c0_i32 = arith.constant 0 : i32
    %c0_i32_0 = arith.constant 0 : i32
    %c0_i32_1 = arith.constant 0 : i32
    return %c0_i32, %c0_i32_0 : i32, i32
  }
  func.func @transform_13(%arg0: i32) -> (i32, i32) {
    %c0_i32 = arith.constant 0 : i32
    %c0_i32_0 = arith.constant 0 : i32
    return %arg0, %c0_i32 : i32, i32
  }
}

</mosaic_0001>

<bundles_post_ra>
// kernel: squeeze.1
= control target key start
LH: loop header
LB: loop body
LE: loop exit
PB: predicated region body
PF: predicated region fallthrough
CT: control target
= control target key end

     0   :  { %s125_s0 = inlined_call_operand.vmem [shape: f32[128], index: 0, kind: input, shape index: {}]   ;;  %s126_s1 = inlined_call_operand.hbm [shape: f32[8,16], index: 1, kind: output, shape index: {}]  }
   0x1   :  { %v6_v0 = vld [vmem:[%s125_s0] sm:$0x1] }
   0x2   :  { %7 = vst [vmem:[#allocation2] sm:$0x1] %v6_v0 }
   0x3   :  { %2 = vsyncpa [#allocation1], 0  ;;  %s93_s0 = smov 112   ;;  %s94_s8 = smov 80   ;;  %vm9_vm0 = vcmask 130048  }
   0x4   :  { %s95_s9 = smov 96   ;;  %s96_s10 = smov 64  }
   0x5   :  { %s97_s11 = smov 48   ;;  %s98_s12 = smov 32  }
   0x6   :  { %s99_s13 = smov 16   ;;  %s100_s14 = smov [#allocation0]  }
   0x7   :  { %s57_s15 = sshll.u32 %s100_s14, 4  ;;  %s58_s15 = int_to_ptr.vmem [resolvable:$true] %s57_s15 }
   0x8   :  { %s71_s16 = scalar_lea.vmem %s58_s15, 128  ;;  %p76_p1 = scmp.lt.s32.totalorder %s58_s15, %s58_s15 }
   0x9   :  { %v11_v1 = vld [vmem:[#allocation2] sm:$0x1]   ;;  %p72_p0 = scmp.ne.s32.totalorder %s58_s15, %s71_s16  ;;  %p77_p2 = scmp.lt.s32.totalorder %s71_s16, %s71_s16 }
   0xa   :  { %v23_v2 = vld [vmem:[#allocation2] sm:$0x1]   ;;  %12 = vrot.lane.b32.xlu0 %v11_v1, %s93_s0 }
   0xb   :  { %24 = vrot.lane.b32.xlu1 %v23_v2, %s94_s8  ;;  %v17_v3 = vld [vmem:[#allocation2] sm:$0x1]   ;;  %p78_p3 = por %p77_p2, %p76_p1 }
   0xc   :  { %v29_v4 = vld [vmem:[#allocation2] sm:$0x1]  }
   0xd   :  { %v8_v5 = vld [vmem:[#allocation2] sm:$0x1]   ;;  %p79_p4 = pnand %p78_p3, %p72_p0 }
   0xe   :  { %10 = vst.msk [vmem:[#allocation0] sm:$0x1] %vm9_vm0, %v8_v5   ;;  %18 = vrot.lane.b32.xlu0 %v17_v3, %s95_s9  ;;  %v35_v6 = vld [vmem:[#allocation2] sm:$0x1]  }
   0xf   :  { %30 = vrot.lane.b32.xlu1 %v29_v4, %s96_s10  ;;  %v41_v7 = vld [vmem:[#allocation2] sm:$0x1]  }
  0x10   :  { %v47_v8 = vld [vmem:[#allocation2] sm:$0x1]  }
  0x12   :  { %36 = vrot.lane.b32.xlu0 %v35_v6, %s97_s11 }
  0x13   :  { %42 = vrot.lane.b32.xlu1 %v41_v7, %s98_s12 }
  0x16   :  { %48 = vrot.lane.b32.xlu0 %v47_v8, %s99_s13 }
  0x7c   :  { %v13_v9 = vpop.permute.xlu0 %12  }
  0x7d   :  { %v25_v10 = vpop.permute.xlu1 %24   ;;  %16 = vst.msk [vmem:[#allocation0 + $0x1] sm:$0x1] %vm9_vm0, %v13_v9  }
  0x7e   :  { %28 = vst.msk [vmem:[#allocation0 + $0x3] sm:$0x1] %vm9_vm0, %v25_v10  }
  0x80   :  { %v19_v11 = vpop.permute.xlu0 %18  }
  0x81   :  { %v31_v12 = vpop.permute.xlu1 %30   ;;  %22 = vst.msk [vmem:[#allocation0 + $0x2] sm:$0x1] %vm9_vm0, %v19_v11  }
  0x82   :  { %34 = vst.msk [vmem:[#allocation0 + $0x4] sm:$0x1] %vm9_vm0, %v31_v12  }
  0x84   :  { %v37_v13 = vpop.permute.xlu0 %36  }
  0x85   :  { %v43_v14 = vpop.permute.xlu1 %42   ;;  %40 = vst.msk [vmem:[#allocation0 + $0x5] sm:$0x1] %vm9_vm0, %v37_v13  }
  0x86   :  { %46 = vst.msk [vmem:[#allocation0 + $0x6] sm:$0x1] %vm9_vm0, %v43_v14  }
  0x88   :  { %v49_v15 = vpop.permute.xlu0 %48  }
  0x89   :  { %52 = vst.msk [vmem:[#allocation0 + $0x7] sm:$0x1] %vm9_vm0, %v49_v15  }
  0x8a   :  { %82 = shalt.err (!%p79_p4)
}
  0x8b   :  { %60 = dma.vmem_to_hbm [thread:$0]  %s58_s15, 128, %s126_s1, [#allocation1]  }
  0x8c   :  { %91 = dma.done.wait [#allocation1], 128  }
  0x8d   :  { %92 = vsyncadd [#allocation1], 4294967168 }
  0x8e   :  { %62 = vsyncpa [#allocation1], 1 }

// kernel: cluster_weighter_forward.1
= control target key start
LH: loop header
LB: loop body
LE: loop exit
PB: predicated region body
PF: predicated region fallthrough
CT: control target
= control target key end

     0   :  { %v1780_v3 = vmov 0   ;;  %vm98_vm0 = vcmask 130048   ;;  %vm690_vm1 = vcmask 523264   ;;  %s2360_s4 = inlined_call_operand.vmem [shape: f32[16,64], index: 4, kind: input, shape index: {}]   ;;  %s2361_s3 = inlined_call_operand.vmem [shape: f32[16,64], index: 3, kind: input, shape index: {}]   ;;  %s2362_s1 = inlined_call_operand.vmem [shape: f32[128,16], index: 1, kind: input, shape index: {}]   ;;  %s2363_s0 = inlined_call_operand.vmem [shape: f32[128,16], index: 0, kind: input, shape index: {}]   ;;  %s2364_s2 = inlined_call_operand.vmem [shape: f32[128,1], index: 2, kind: input, shape index: {}]   ;;  %s2365_s7 = inlined_call_operand.vmem [shape: f32[64,16], index: 7, kind: input, shape index: {}]   ;;  %s2366_s9 = inlined_call_operand.vmem [shape: f32[16,16], index: 9, kind: input, shape index: {}]   ;;  %s2367_s5 = inlined_call_operand.vmem [shape: f32[1,64], index: 5, kind: input, shape index: {}]   ;;  %s2368_s6 = inlined_call_operand.vmem [shape: f32[1,64], index: 6, kind: input, shape index: {}]   ;;  %s2369_s8 = inlined_call_operand.vmem [shape: f32[1,16], index: 8, kind: input, shape index: {}]   ;;  %s2370_s12 = inlined_call_operand.<no memory space> [shape: f32[1,1], index: 12, kind: input, shape index: {}]   ;;  %s2371_s10 = inlined_call_operand.vmem [shape: f32[1,16], index: 10, kind: input, shape index: {}]   ;;  %s2372_s11 = inlined_call_operand.vmem [shape: f32[1,16], index: 11, kind: input, shape index: {}]   ;;  %s2373_s13 = inlined_call_operand.vmem [shape: f32[128,1], index: 13, kind: output, shape index: {}]  }
   0x1   :  { %v97_v0 = vld [vmem:[%s2360_s4 + $0x8] sm:$0xff]  ;;  %v96_v2 = vld [vmem:[%s2360_s4] sm:$0xff]  ;;  %1698 = vset.pattern.permute.xlu0 %v1780_v3  ;;  %1699 = vset.pattern.permute.xlu1 %v1780_v3  ;;  %v82_v9 = vld [vmem:[%s2362_s1 + $0x10] sm:$0xff] }
   0x2   :  { %v79_v1 = vld [vmem:[%s2361_s3 + $0x8] sm:$0xff]  ;;  %1573 = vmatprep.subr.mxu0 %v97_v0  ;;  %v78_v4 = vld [vmem:[%s2361_s3] sm:$0xff]  ;;  %v64_v10 = vld [vmem:[%s2363_s0 + $0x10] sm:$0xff] }
   0x3   :  { %1601 = vmatprep.subr.mxu1 %v79_v1  ;;  %v80_v5 = vld [vmem:[%s2362_s1] sm:$0xff]  ;;  %1574 = vmatpush3.msra.mxu0 %v97_v0  ;;  %v81_v7 = vld [vmem:[%s2362_s1 + $0x8] sm:$0xff]  ;;  %v83_v11 = vld [vmem:[%s2362_s1 + $0x18] sm:$0xff] }
   0x4   :  { %1602 = vmatpush3.msra.mxu1 %v79_v1  ;;  %v62_v6 = vld [vmem:[%s2363_s0] sm:$0xff]  ;;  %1575 = vmatprep.subr.mxu0 %v96_v2  ;;  %v63_v8 = vld [vmem:[%s2363_s0 + $0x8] sm:$0xff]  ;;  %v65_v12 = vld [vmem:[%s2363_s0 + $0x18] sm:$0xff] }
   0x5   :  { %1603 = vmatprep.subr.mxu1 %v78_v4  ;;  %1576 = vmatpush3.msra.mxu0 %v96_v2  ;;  %v84_v13 = vld [vmem:[%s2362_s1 + $0x20] sm:$0xff]  ;;  %v85_v15 = vld [vmem:[%s2362_s1 + $0x28] sm:$0xff]  ;;  %v86_v17 = vld [vmem:[%s2362_s1 + $0x30] sm:$0xff] }
   0x6   :  { %1577 = vmatprep.mubr.msk.f32.mxu0 %vm98_vm0, %v80_v5  ;;  %1604 = vmatpush3.msra.mxu1 %v78_v4  ;;  %v66_v14 = vld [vmem:[%s2363_s0 + $0x20] sm:$0xff]  ;;  %v67_v16 = vld [vmem:[%s2363_s0 + $0x28] sm:$0xff]  ;;  %v68_v18 = vld [vmem:[%s2363_s0 + $0x30] sm:$0xff] }
   0x7   :  { %1605 = vmatprep.mubr.msk.f32.mxu1 %vm98_vm0, %v62_v6  ;;  %1578 = vmatmul.mubr.msk.f32.vlgmr.msra.gmra.mxu0 %vm98_vm0, %v81_v7  ;;  %v46_v19 = vld [vmem:[%s2364_s2] sm:$0xff]  ;;  %v48_v20 = vld [vmem:[%s2364_s2 + $0x10] sm:$0xff]  ;;  %v47_v21 = vld [vmem:[%s2364_s2 + $0x8] sm:$0xff] }
   0x8   :  { %1606 = vmatmul.mubr.msk.f32.vlgmr.msra.gmra.mxu1 %vm98_vm0, %v63_v8  ;;  %1580 = vmatprep.mubr.msk.f32.mxu0 %vm98_vm0, %v82_v9  ;;  %v49_v22 = vld [vmem:[%s2364_s2 + $0x18] sm:$0xff]  ;;  %v88_v25 = vld [vmem:[%s2362_s1 + $0x40] sm:$0xff]  ;;  %v51_v28 = vld [vmem:[%s2364_s2 + $0x28] sm:$0xff] }
   0x9   :  { %1608 = vmatprep.mubr.msk.f32.mxu1 %vm98_vm0, %v64_v10  ;;  %488 = vperm.xlu0 %1698, %v46_v19   ;;  %v87_v23 = vld [vmem:[%s2362_s1 + $0x38] sm:$0xff]  ;;  %v70_v26 = vld [vmem:[%s2363_s0 + $0x40] sm:$0xff]  ;;  %v89_v30 = vld [vmem:[%s2362_s1 + $0x48] sm:$0xff] }
   0xa   :  { %498 = vperm.xlu1 %1699, %v48_v20   ;;  %v69_v24 = vld [vmem:[%s2363_s0 + $0x38] sm:$0xff]  ;;  %v50_v27 = vld [vmem:[%s2364_s2 + $0x20] sm:$0xff]  ;;  %v71_v31 = vld [vmem:[%s2363_s0 + $0x48] sm:$0xff] }
   0xb   :  { %1581 = vmatmul.mubr.msk.f32.gmra.mxu0 %vm98_vm0, %v83_v11  ;;  %v682_v29 = vld [vmem:[%s2365_s7 + $0x38] sm:$0xff]  ;;  %v90_v32 = vld [vmem:[%s2362_s1 + $0x50] sm:$0xff]  ;;  %v92_v38 = vld [vmem:[%s2362_s1 + $0x60] sm:$0xff] }
   0xc   :  { %1609 = vmatmul.mubr.msk.f32.gmra.mxu1 %vm98_vm0, %v65_v12  ;;  %1583 = vmatprep.mubr.msk.f32.mxu0 %vm98_vm0, %v84_v13  ;;  %v72_v33 = vld [vmem:[%s2363_s0 + $0x50] sm:$0xff]  ;;  %v53_v35 = vld [vmem:[%s2364_s2 + $0x38] sm:$0xff]  ;;  %v74_v39 = vld [vmem:[%s2363_s0 + $0x60] sm:$0xff] }
   0xd   :  { %1611 = vmatprep.mubr.msk.f32.mxu1 %vm98_vm0, %v66_v14  ;;  %493 = vperm.xlu0 %1698, %v47_v21   ;;  %v52_v34 = vld [vmem:[%s2364_s2 + $0x30] sm:$0xff]  ;;  %v91_v36 = vld [vmem:[%s2362_s1 + $0x58] sm:$0xff]  ;;  %v54_v41 = vld [vmem:[%s2364_s2 + $0x40] sm:$0xff] }
   0xe   :  { %503 = vperm.xlu1 %1699, %v49_v22   ;;  %1629 = vmatprep.subr.mxu0 %v682_v29  ;;  %v73_v37 = vld [vmem:[%s2363_s0 + $0x58] sm:$0xff]  ;;  %v681_v40 = vld [vmem:[%s2365_s7 + $0x30] sm:$0xff]  ;;  %v55_v42 = vld [vmem:[%s2364_s2 + $0x48] sm:$0xff] }
   0xf   :  { %1584 = vmatmul.mubr.msk.f32.gmra.mxu0 %vm98_vm0, %v85_v15  ;;  %v93_v43 = vld [vmem:[%s2362_s1 + $0x68] sm:$0xff]  ;;  %v94_v45 = vld [vmem:[%s2362_s1 + $0x70] sm:$0xff]  ;;  %v57_v48 = vld [vmem:[%s2364_s2 + $0x58] sm:$0xff] }
  0x10   :  { %1612 = vmatmul.mubr.msk.f32.gmra.mxu1 %vm98_vm0, %v67_v16  ;;  %1586 = vmatprep.mubr.msk.f32.mxu0 %vm98_vm0, %v86_v17  ;;  %v75_v44 = vld [vmem:[%s2363_s0 + $0x68] sm:$0xff]  ;;  %v76_v46 = vld [vmem:[%s2363_s0 + $0x70] sm:$0xff]  ;;  %v95_v49 = vld [vmem:[%s2362_s1 + $0x78] sm:$0xff] }
  0x11   :  { %1614 = vmatprep.mubr.msk.f32.mxu1 %vm98_vm0, %v68_v18  ;;  %508 = vperm.xlu0 %1698, %v50_v27   ;;  %v56_v47 = vld [vmem:[%s2364_s2 + $0x50] sm:$0xff]  ;;  %v77_v50 = vld [vmem:[%s2363_s0 + $0x78] sm:$0xff]  ;;  %v680_v51 = vld [vmem:[%s2365_s7 + $0x28] sm:$0xff] }
  0x12   :  { %513 = vperm.xlu1 %1699, %v51_v28   ;;  %1630 = vmatpush3.msra.mxu0 %v682_v29  ;;  %v58_v52 = vld [vmem:[%s2364_s2 + $0x60] sm:$0xff]  ;;  %v59_v53 = vld [vmem:[%s2364_s2 + $0x68] sm:$0xff]  ;;  %v678_v55 = vld [vmem:[%s2365_s7 + $0x18] sm:$0xff] }
  0x13   :  { %1587 = vmatmul.mubr.msk.f32.gmra.mxu0 %vm98_vm0, %v87_v23  ;;  %1631 = vmatprep.subr.mxu0 %v681_v40  ;;  %v679_v54 = vld [vmem:[%s2365_s7 + $0x20] sm:$0xff]  ;;  %v60_v56 = vld [vmem:[%s2364_s2 + $0x70] sm:$0xff]  ;;  %v61_v57 = vld [vmem:[%s2364_s2 + $0x78] sm:$0xff] }
  0x14   :  { %1615 = vmatmul.mubr.msk.f32.gmra.mxu1 %vm98_vm0, %v69_v24  ;;  %1589 = vmatprep.mubr.msk.f32.mxu0 %vm98_vm0, %v88_v25  ;;  %v677_v58 = vld [vmem:[%s2365_s7 + $0x10] sm:$0xff]  ;;  %v676_v59 = vld [vmem:[%s2365_s7 + $0x8] sm:$0xff]  ;;  %v675_v60 = vld [vmem:[%s2365_s7] sm:$0xff] }
  0x15   :  { %1617 = vmatprep.mubr.msk.f32.mxu1 %vm98_vm0, %v70_v26  ;;  %518 = vperm.xlu0 %1698, %v52_v34   ;;  %v933_v61 = vld [vmem:[%s2366_s9 + $0x8] sm:$0xff]  ;;  %v932_v62 = vld [vmem:[%s2366_s9] sm:$0xff] }
  0x16   :  { %523 = vperm.xlu1 %1699, %v53_v35   ;;  %1632 = vmatpush3.msra.mxu0 %v681_v40  ;;  %v2072_v4 = vld [vmem:[%s2367_s5] ss:$0 sm:$0xff] }
  0x17   :  { %1590 = vmatmul.mubr.msk.f32.gmra.mxu0 %vm98_vm0, %v89_v30  ;;  %1633 = vmatprep.subr.mxu0 %v680_v51  ;;  %v2078_v11 = vld [vmem:[%s2368_s6] ss:$0 sm:$0xff] }
  0x18   :  { %1618 = vmatmul.mubr.msk.f32.gmra.mxu1 %vm98_vm0, %v71_v31  ;;  %1592 = vmatprep.mubr.msk.f32.mxu0 %vm98_vm0, %v90_v32 }
  0x19   :  { %1620 = vmatprep.mubr.msk.f32.mxu1 %vm98_vm0, %v72_v33  ;;  %528 = vperm.xlu0 %1698, %v54_v41  }
  0x1a   :  { %533 = vperm.xlu1 %1699, %v55_v42   ;;  %1634 = vmatpush3.msra.mxu0 %v680_v51 }
  0x1b   :  { %1593 = vmatmul.mubr.msk.f32.gmra.mxu0 %vm98_vm0, %v91_v36  ;;  %1635 = vmatprep.subr.mxu0 %v679_v54 }
  0x1c   :  { %1621 = vmatmul.mubr.msk.f32.gmra.mxu1 %vm98_vm0, %v73_v37  ;;  %1595 = vmatprep.mubr.msk.f32.mxu0 %vm98_vm0, %v92_v38 }
  0x1d   :  { %1623 = vmatprep.mubr.msk.f32.mxu1 %vm98_vm0, %v74_v39  ;;  %538 = vperm.xlu0 %1698, %v56_v47  }
  0x1e   :  { %543 = vperm.xlu1 %1699, %v57_v48   ;;  %1636 = vmatpush3.msra.mxu0 %v679_v54 }
  0x1f   :  { %1596 = vmatmul.mubr.msk.f32.gmra.mxu0 %vm98_vm0, %v93_v43  ;;  %1637 = vmatprep.subr.mxu0 %v678_v55 }
  0x20   :  { %1624 = vmatmul.mubr.msk.f32.gmra.mxu1 %vm98_vm0, %v75_v44  ;;  %1598 = vmatprep.mubr.msk.f32.mxu0 %vm98_vm0, %v94_v45 }
  0x21   :  { %1626 = vmatprep.mubr.msk.f32.mxu1 %vm98_vm0, %v76_v46  ;;  %548 = vperm.xlu0 %1698, %v58_v52  }
  0x22   :  { %553 = vperm.xlu1 %1699, %v59_v53   ;;  %1638 = vmatpush3.msra.mxu0 %v678_v55 }
  0x23   :  { %1599 = vmatmul.mubr.msk.f32.gmra.mxu0 %vm98_vm0, %v95_v49  ;;  %1639 = vmatprep.subr.mxu0 %v677_v58 }
  0x24   :  { %1627 = vmatmul.mubr.msk.f32.gmra.mxu1 %vm98_vm0, %v77_v50  ;;  %1640 = vmatpush3.msra.mxu0 %v677_v58 }
  0x25   :  { %558 = vperm.xlu0 %1698, %v60_v56   ;;  %1641 = vmatprep.subr.mxu0 %v676_v59 }
  0x26   :  { %563 = vperm.xlu1 %1699, %v61_v57   ;;  %1642 = vmatpush3.msra.mxu0 %v676_v59 }
  0x27   :  { %1643 = vmatprep.subr.mxu0 %v675_v60  ;;  %1669 = vmatprep.subr.mxu1 %v933_v61 }
  0x28   :  { %1644 = vmatpush3.msra.mxu0 %v675_v60  ;;  %1670 = vmatpush3.msra.mxu1 %v933_v61 }
  0x29   :  { %1671 = vmatprep.subr.mxu1 %v932_v62 }
  0x2a   :  { %1672 = vmatpush3.msra.mxu1 %v932_v62 }
  0x84   :  { %v489_v0 = vpop.permute.xlu0 %488 }
  0x85   :  { %v499_v63 = vpop.permute.xlu1 %498  ;;  %v572_v14 = vmul.f32 %v2072_v4, %v489_v0 }
  0x86   :  { %v574_v25 = vmul.f32 %v2072_v4, %v499_v63 }
  0x88   :  { %v494_v2 = vpop.permute.xlu0 %493 }
  0x89   :  { %v504_v1 = vpop.permute.xlu1 %503  ;;  %v573_v6 = vmul.f32 %v2072_v4, %v494_v2 }
  0x8a   :  { %v575_v15 = vmul.f32 %v2072_v4, %v504_v1 }
  0x8c   :  { %v509_v5 = vpop.permute.xlu0 %508 }
  0x8d   :  { %v514_v3 = vpop.permute.xlu1 %513  ;;  %v576_v42 = vmul.f32 %v2072_v4, %v509_v5 }
  0x8e   :  { %v577_v30 = vmul.f32 %v2072_v4, %v514_v3 }
  0x90   :  { %v519_v16 = vpop.permute.xlu0 %518 }
  0x91   :  { %v524_v7 = vpop.permute.xlu1 %523  ;;  %v578_v56 = vmul.f32 %v2072_v4, %v519_v16 }
  0x92   :  { %v579_v47 = vmul.f32 %v2072_v4, %v524_v7 }
  0x94   :  { %v529_v35 = vpop.permute.xlu0 %528 }
  0x95   :  { %v534_v21 = vpop.permute.xlu1 %533 }
  0x96   :  { %v581_v61 = vmul.f32 %v2072_v4, %v534_v21 }
  0x98   :  { %v539_v60 = vpop.permute.xlu0 %538 }
  0x99   :  { %v544_v43 = vpop.permute.xlu1 %543 }
  0x9a   :  { %v583_v16 = vmul.f32 %v2072_v4, %v544_v43 }
  0x9d   :  { %v554_v7 = vpop.permute.xlu1 %553 }
  0xc7   :  { %v1579_v8 = vpop.f32.mrf.mxu0 }
  0xc8   :  { %v1607_v9 = vpop.f32.mrf.mxu1 }
  0xc9   :  { %v412_v10 = vadd.f32 %v1607_v9, %v1579_v8  ;;  %v213_v12 = vpop.f32.mrf.mxu0 }
  0xca   :  { %v406_v13 = vpop.f32.mrf.mxu1 }
  0xcb   :  { %v589_v17 = vadd.f32 %v573_v6, %v412_v10  ;;  %v407_v18 = vadd.f32 %v406_v13, %v213_v12  ;;  %v1582_v19 = vpop.f32.mrf.mxu0  ;;  %v580_v12 = vmul.f32 %v2072_v4, %v529_v35 }
  0xcc   :  { %v1610_v20 = vpop.f32.mrf.mxu1 }
  0xcd   :  { %v612_v22 = vadd.f32 %v2078_v11, %v589_v17  ;;  %v588_v23 = vadd.f32 %v572_v14, %v407_v18  ;;  %v422_v24 = vadd.f32 %v1610_v20, %v1582_v19  ;;  %v223_v26 = vpop.f32.mrf.mxu0 }
  0xce   :  { %v416_v27 = vpop.f32.mrf.mxu1 }
  0xcf   :  { %v611_v28 = vadd.f32 %v2078_v11, %v588_v23  ;;  %v591_v29 = vadd.f32 %v575_v15, %v422_v24  ;;  %vm628_vm2 = vcmp.ge.f32.partialorder %v612_v22, 0.0  ;;  %v644_v31 = vmul.f32 0.01, %v612_v22  ;;  %v1585_v33 = vpop.f32.mrf.mxu0 }
  0xd0   :  { %v417_v32 = vadd.f32 %v416_v27, %v223_v26  ;;  %v1613_v34 = vpop.f32.mrf.mxu1 }
  0xd1   :  { %v614_v36 = vadd.f32 %v2078_v11, %v591_v29  ;;  %v432_v37 = vadd.f32 %v1613_v34, %v1585_v33  ;;  %vm627_vm3 = vcmp.ge.f32.partialorder %v611_v28, 0.0  ;;  %v643_v38 = vmul.f32 0.01, %v611_v28  ;;  %v233_v40 = vpop.f32.mrf.mxu0  ;;  %v564_v34 = vpop.permute.xlu1 %563 }
  0xd2   :  { %v590_v39 = vadd.f32 %v574_v25, %v417_v32  ;;  %v426_v41 = vpop.f32.mrf.mxu1  ;;  %v660_v51 = vsel %vm628_vm2, %v612_v22, %v644_v31  ;;  %v549_v25 = vpop.permute.xlu0 %548  ;;  %v582_v29 = vmul.f32 %v2072_v4, %v539_v60  ;;  %v585_v33 = vmul.f32 %v2072_v4, %v554_v7 }
  0xd3   :  { %v593_v44 = vadd.f32 %v577_v30, %v432_v37  ;;  %v427_v45 = vadd.f32 %v426_v41, %v233_v40  ;;  %v659_v46 = vsel %vm627_vm3, %v611_v28, %v643_v38  ;;  %v1588_v49 = vpop.f32.mrf.mxu0  ;;  %v646_v52 = vmul.f32 0.01, %v614_v36 }
  0xd4   :  { %v613_v48 = vadd.f32 %v2078_v11, %v590_v39  ;;  %v1616_v50 = vpop.f32.mrf.mxu1  ;;  %1645 = vmatprep.mubr.msk.f32.mxu0 %vm690_vm1, %v659_v46  ;;  %vm630_vm4 = vcmp.ge.f32.partialorder %v614_v36, 0.0  ;;  %v584_v46 = vmul.f32 %v2072_v4, %v549_v25 }
  0xd5   :  { %v616_v53 = vadd.f32 %v2078_v11, %v593_v44  ;;  %v592_v54 = vadd.f32 %v576_v42, %v427_v45  ;;  %v442_v55 = vadd.f32 %v1616_v50, %v1588_v49  ;;  %1646 = vmatmul.mubr.msk.f32.vlgmr.msra.gmra.mxu0 %vm690_vm1, %v660_v51  ;;  %v243_v57 = vpop.f32.mrf.mxu0  ;;  %v662_v5 = vsel %vm630_vm4, %v614_v36, %v646_v52 }
  0xd6   :  { %v436_v58 = vpop.f32.mrf.mxu1  ;;  %vm629_vm5 = vcmp.ge.f32.partialorder %v613_v48, 0.0  ;;  %v645_v59 = vmul.f32 0.01, %v613_v48  ;;  %v559_v50 = vpop.permute.xlu0 %558  ;;  %v587_v51 = vmul.f32 %v2072_v4, %v564_v34 }
  0xd7   :  { %v615_v62 = vadd.f32 %v2078_v11, %v592_v54  ;;  %v595_v63 = vadd.f32 %v579_v47, %v442_v55  ;;  %v437_v0 = vadd.f32 %v436_v58, %v243_v57  ;;  %v1591_v1 = vpop.f32.mrf.mxu0  ;;  %vm632_vm6 = vcmp.ge.f32.partialorder %v616_v53, 0.0 }
  0xd8   :  { %v1619_v2 = vpop.f32.mrf.mxu1  ;;  %v661_v3 = vsel %vm629_vm5, %v613_v48, %v645_v59  ;;  %v648_v6 = vmul.f32 0.01, %v616_v53 }
  0xd9   :  { %v618_v8 = vadd.f32 %v2078_v11, %v595_v63  ;;  %v594_v9 = vadd.f32 %v578_v56, %v437_v0  ;;  %v452_v10 = vadd.f32 %v1619_v2, %v1591_v1  ;;  %1648 = vmatprep.mubr.msk.f32.mxu0 %vm690_vm1, %v661_v3  ;;  %vm631_vm7 = vcmp.ge.f32.partialorder %v615_v62, 0.0  ;;  %v253_v13 = vpop.f32.mrf.mxu0 }
  0xda   :  { %1649 = vmatmul.mubr.msk.f32.gmra.mxu0 %vm690_vm1, %v662_v5  ;;  %v446_v14 = vpop.f32.mrf.mxu1  ;;  %v647_v15 = vmul.f32 0.01, %v615_v62  ;;  %v664_v23 = vsel %vm632_vm6, %v616_v53, %v648_v6  ;;  %v586_v2 = vmul.f32 %v2072_v4, %v559_v50 }
  0xdb   :  { %v617_v17 = vadd.f32 %v2078_v11, %v594_v9  ;;  %v597_v18 = vadd.f32 %v581_v61, %v452_v10  ;;  %v447_v19 = vadd.f32 %v446_v14, %v253_v13  ;;  %v1594_v20 = vpop.f32.mrf.mxu0  ;;  %vm634_vm8 = vcmp.ge.f32.partialorder %v618_v8, 0.0 }
  0xdc   :  { %v1622_v21 = vpop.f32.mrf.mxu1  ;;  %v663_v22 = vsel %vm631_vm7, %v615_v62, %v647_v15  ;;  %v650_v24 = vmul.f32 0.01, %v618_v8 }
  0xdd   :  { %v620_v26 = vadd.f32 %v2078_v11, %v597_v18  ;;  %v596_v27 = vadd.f32 %v580_v12, %v447_v19  ;;  %v462_v28 = vadd.f32 %v1622_v21, %v1594_v20  ;;  %1651 = vmatprep.mubr.msk.f32.mxu0 %vm690_vm1, %v663_v22  ;;  %vm633_vm9 = vcmp.ge.f32.partialorder %v617_v17, 0.0  ;;  %v263_v30 = vpop.f32.mrf.mxu0 }
  0xde   :  { %1652 = vmatmul.mubr.msk.f32.gmra.mxu0 %vm690_vm1, %v664_v23  ;;  %v456_v31 = vpop.f32.mrf.mxu1  ;;  %v649_v32 = vmul.f32 0.01, %v617_v17  ;;  %v666_v41 = vsel %vm634_vm8, %v618_v8, %v650_v24 }
  0xdf   :  { %v619_v35 = vadd.f32 %v2078_v11, %v596_v27  ;;  %v599_v36 = vadd.f32 %v583_v16, %v462_v28  ;;  %v457_v37 = vadd.f32 %v456_v31, %v263_v30  ;;  %v1597_v38 = vpop.f32.mrf.mxu0  ;;  %vm636_vm10 = vcmp.ge.f32.partialorder %v620_v26, 0.0 }
  0xe0   :  { %v1625_v39 = vpop.f32.mrf.mxu1  ;;  %v665_v40 = vsel %vm633_vm9, %v617_v17, %v649_v32  ;;  %v652_v42 = vmul.f32 0.01, %v620_v26 }
  0xe1   :  { %v622_v43 = vadd.f32 %v2078_v11, %v599_v36  ;;  %v598_v44 = vadd.f32 %v582_v29, %v457_v37  ;;  %v472_v45 = vadd.f32 %v1625_v39, %v1597_v38  ;;  %1654 = vmatprep.mubr.msk.f32.mxu0 %vm690_vm1, %v665_v40  ;;  %vm635_vm11 = vcmp.ge.f32.partialorder %v619_v35, 0.0  ;;  %v273_v47 = vpop.f32.mrf.mxu0 }
  0xe2   :  { %1655 = vmatmul.mubr.msk.f32.gmra.mxu0 %vm690_vm1, %v666_v41  ;;  %v466_v48 = vpop.f32.mrf.mxu1  ;;  %v651_v49 = vmul.f32 0.01, %v619_v35  ;;  %v668_v58 = vsel %vm636_vm10, %v620_v26, %v652_v42 }
  0xe3   :  { %v621_v52 = vadd.f32 %v2078_v11, %v598_v44  ;;  %v601_v53 = vadd.f32 %v585_v33, %v472_v45  ;;  %v467_v54 = vadd.f32 %v466_v48, %v273_v47  ;;  %v1600_v55 = vpop.f32.mrf.mxu0  ;;  %vm638_vm12 = vcmp.ge.f32.partialorder %v622_v43, 0.0 }
  0xe4   :  { %v1628_v56 = vpop.f32.mrf.mxu1  ;;  %v667_v57 = vsel %vm635_vm11, %v619_v35, %v651_v49  ;;  %v654_v59 = vmul.f32 0.01, %v622_v43 }
  0xe5   :  { %v624_v60 = vadd.f32 %v2078_v11, %v601_v53  ;;  %v600_v61 = vadd.f32 %v584_v46, %v467_v54  ;;  %v482_v62 = vadd.f32 %v1628_v56, %v1600_v55  ;;  %1657 = vmatprep.mubr.msk.f32.mxu0 %vm690_vm1, %v667_v57  ;;  %vm637_vm13 = vcmp.ge.f32.partialorder %v621_v52, 0.0  ;;  %v283_v63 = vpop.f32.mrf.mxu0 }
  0xe6   :  { %1658 = vmatmul.mubr.msk.f32.gmra.mxu0 %vm690_vm1, %v668_v58  ;;  %v476_v0 = vpop.f32.mrf.mxu1  ;;  %v653_v1 = vmul.f32 0.01, %v621_v52  ;;  %v670_v8 = vsel %vm638_vm12, %v622_v43, %v654_v59 }
  0xe7   :  { %v623_v3 = vadd.f32 %v2078_v11, %v600_v61  ;;  %v603_v5 = vadd.f32 %v587_v51, %v482_v62  ;;  %v477_v6 = vadd.f32 %v476_v0, %v283_v63  ;;  %v656_v9 = vmul.f32 0.01, %v624_v60 }
  0xe8   :  { %v669_v7 = vsel %vm637_vm13, %v621_v52, %v653_v1  ;;  %vm640_vm15 = vcmp.ge.f32.partialorder %v624_v60, 0.0 }
  0xe9   :  { %v626_v10 = vadd.f32 %v2078_v11, %v603_v5  ;;  %v602_v12 = vadd.f32 %v586_v2, %v477_v6  ;;  %1660 = vmatprep.mubr.msk.f32.mxu0 %vm690_vm1, %v669_v7  ;;  %vm639_vm14 = vcmp.ge.f32.partialorder %v623_v3, 0.0  ;;  %v655_v13 = vmul.f32 0.01, %v623_v3 }
  0xea   :  { %1661 = vmatmul.mubr.msk.f32.gmra.mxu0 %vm690_vm1, %v670_v8  ;;  %v672_v15 = vsel %vm640_vm15, %v624_v60, %v656_v9 }
  0xeb   :  { %v625_v4 = vadd.f32 %v2078_v11, %v602_v12  ;;  %v671_v14 = vsel %vm639_vm14, %v623_v3, %v655_v13  ;;  %v658_v17 = vmul.f32 0.01, %v626_v10  ;;  %vm642_vm3 = vcmp.ge.f32.partialorder %v626_v10, 0.0  ;;  %v2135_v11 = vld [vmem:[%s2369_s8] ss:$0 sm:$0xff] }
  0xec   :  { %1663 = vmatprep.mubr.msk.f32.mxu0 %vm690_vm1, %v671_v14 }
  0xed   :  { %vm641_vm2 = vcmp.ge.f32.partialorder %v625_v4, 0.0  ;;  %v657_v16 = vmul.f32 0.01, %v625_v4  ;;  %v674_v19 = vsel %vm642_vm3, %v626_v10, %v658_v17 }
  0xee   :  { %1664 = vmatmul.mubr.msk.f32.gmra.mxu0 %vm690_vm1, %v672_v15 }
  0xef   :  { %v673_v18 = vsel %vm641_vm2, %v625_v4, %v657_v16 }
  0xf0   :  { %1666 = vmatprep.mubr.msk.f32.mxu0 %vm690_vm1, %v673_v18 }
  0xf2   :  { %1667 = vmatmul.mubr.msk.f32.gmra.mxu0 %vm690_vm1, %v674_v19 }
 0x195   :  { %v1647_v20 = vpop.f32.mrf.mxu0 }
 0x196   :  { %v811_v21 = vadd.f32 %v1647_v20, %v2135_v11 }
 0x197   :  { %v805_v22 = vpop.f32.mrf.mxu0 }
 0x198   :  { %v806_v23 = vadd.f32 %v2135_v11, %v805_v22  ;;  %v901_v24 = vmul.f32 0.01, %v811_v21  ;;  %vm885_vm4 = vcmp.ge.f32.partialorder %v811_v21, 0.0 }
 0x19a   :  { %vm884_vm5 = vcmp.ge.f32.partialorder %v806_v23, 0.0  ;;  %v900_v25 = vmul.f32 0.01, %v806_v23  ;;  %v1650_v26 = vpop.f32.mrf.mxu0  ;;  %v917_v30 = vsel %vm885_vm4, %v811_v21, %v901_v24  ;;  %v2175_v21 = vld [vmem:[%s2371_s10] ss:$0 sm:$0xff] }
 0x19b   :  { %v821_v27 = vadd.f32 %v1650_v26, %v2135_v11 }
 0x19c   :  { %v815_v28 = vpop.f32.mrf.mxu0  ;;  %v916_v29 = vsel %vm884_vm5, %v806_v23, %v900_v25 }
 0x19d   :  { %v816_v31 = vadd.f32 %v2135_v11, %v815_v28  ;;  %1673 = vmatprep.mubr.msk.f32.mxu1 %vm98_vm0, %v916_v29  ;;  %v903_v32 = vmul.f32 0.01, %v821_v27  ;;  %vm887_vm1 = vcmp.ge.f32.partialorder %v821_v27, 0.0 }
 0x19e   :  { %v1653_v33 = vpop.f32.mrf.mxu0  ;;  %1674 = vmatmul.mubr.msk.f32.vlgmr.msra.gmra.mxu1 %vm98_vm0, %v917_v30 }
 0x19f   :  { %vm886_vm6 = vcmp.ge.f32.partialorder %v816_v31, 0.0  ;;  %v902_v34 = vmul.f32 0.01, %v816_v31  ;;  %v831_v35 = vadd.f32 %v1653_v33, %v2135_v11  ;;  %v919_v41 = vsel %vm887_vm1, %v821_v27, %v903_v32  ;;  %v2182_v27 = vld [vmem:[%s2372_s11] ss:$0 sm:$0xff] }
 0x1a0   :  { %v825_v36 = vpop.f32.mrf.mxu0 }
 0x1a1   :  { %v826_v37 = vadd.f32 %v2135_v11, %v825_v36  ;;  %v918_v38 = vsel %vm886_vm6, %v816_v31, %v902_v34  ;;  %v905_v39 = vmul.f32 0.01, %v831_v35  ;;  %vm889_vm7 = vcmp.ge.f32.partialorder %v831_v35, 0.0 }
 0x1a2   :  { %v1656_v40 = vpop.f32.mrf.mxu0  ;;  %1676 = vmatprep.mubr.msk.f32.mxu1 %vm98_vm0, %v918_v38 }
 0x1a3   :  { %vm888_vm8 = vcmp.ge.f32.partialorder %v826_v37, 0.0  ;;  %v904_v42 = vmul.f32 0.01, %v826_v37  ;;  %v841_v43 = vadd.f32 %v1656_v40, %v2135_v11  ;;  %1677 = vmatmul.mubr.msk.f32.gmra.mxu1 %vm98_vm0, %v919_v41  ;;  %v921_v49 = vsel %vm889_vm7, %v831_v35, %v905_v39 }
 0x1a4   :  { %v835_v44 = vpop.f32.mrf.mxu0 }
 0x1a5   :  { %v836_v45 = vadd.f32 %v2135_v11, %v835_v44  ;;  %v920_v46 = vsel %vm888_vm8, %v826_v37, %v904_v42  ;;  %v907_v47 = vmul.f32 0.01, %v841_v43  ;;  %vm891_vm9 = vcmp.ge.f32.partialorder %v841_v43, 0.0 }
 0x1a6   :  { %v1659_v48 = vpop.f32.mrf.mxu0  ;;  %1679 = vmatprep.mubr.msk.f32.mxu1 %vm98_vm0, %v920_v46 }
 0x1a7   :  { %vm890_vm10 = vcmp.ge.f32.partialorder %v836_v45, 0.0  ;;  %v906_v50 = vmul.f32 0.01, %v836_v45  ;;  %v851_v51 = vadd.f32 %v1659_v48, %v2135_v11  ;;  %1680 = vmatmul.mubr.msk.f32.gmra.mxu1 %vm98_vm0, %v921_v49  ;;  %v923_v57 = vsel %vm891_vm9, %v841_v43, %v907_v47 }
 0x1a8   :  { %v845_v52 = vpop.f32.mrf.mxu0 }
 0x1a9   :  { %v846_v53 = vadd.f32 %v2135_v11, %v845_v52  ;;  %v922_v54 = vsel %vm890_vm10, %v836_v45, %v906_v50  ;;  %v909_v55 = vmul.f32 0.01, %v851_v51  ;;  %vm893_vm11 = vcmp.ge.f32.partialorder %v851_v51, 0.0 }
 0x1aa   :  { %v1662_v56 = vpop.f32.mrf.mxu0  ;;  %1682 = vmatprep.mubr.msk.f32.mxu1 %vm98_vm0, %v922_v54 }
 0x1ab   :  { %vm892_vm12 = vcmp.ge.f32.partialorder %v846_v53, 0.0  ;;  %v908_v58 = vmul.f32 0.01, %v846_v53  ;;  %v861_v59 = vadd.f32 %v1662_v56, %v2135_v11  ;;  %1683 = vmatmul.mubr.msk.f32.gmra.mxu1 %vm98_vm0, %v923_v57  ;;  %v925_v1 = vsel %vm893_vm11, %v851_v51, %v909_v55 }
 0x1ac   :  { %v855_v60 = vpop.f32.mrf.mxu0 }
 0x1ad   :  { %v856_v61 = vadd.f32 %v2135_v11, %v855_v60  ;;  %v924_v62 = vsel %vm892_vm12, %v846_v53, %v908_v58  ;;  %v911_v63 = vmul.f32 0.01, %v861_v59  ;;  %vm895_vm13 = vcmp.ge.f32.partialorder %v861_v59, 0.0 }
 0x1ae   :  { %v1665_v0 = vpop.f32.mrf.mxu0  ;;  %1685 = vmatprep.mubr.msk.f32.mxu1 %vm98_vm0, %v924_v62 }
 0x1af   :  { %vm894_vm14 = vcmp.ge.f32.partialorder %v856_v61, 0.0  ;;  %v910_v2 = vmul.f32 0.01, %v856_v61  ;;  %v871_v3 = vadd.f32 %v1665_v0, %v2135_v11  ;;  %1686 = vmatmul.mubr.msk.f32.gmra.mxu1 %vm98_vm0, %v925_v1  ;;  %v927_v10 = vsel %vm895_vm13, %v861_v59, %v911_v63 }
 0x1b0   :  { %v865_v5 = vpop.f32.mrf.mxu0 }
 0x1b1   :  { %v866_v6 = vadd.f32 %v2135_v11, %v865_v5  ;;  %v926_v7 = vsel %vm894_vm14, %v856_v61, %v910_v2  ;;  %v913_v8 = vmul.f32 0.01, %v871_v3  ;;  %vm897_vm15 = vcmp.ge.f32.partialorder %v871_v3, 0.0 }
 0x1b2   :  { %v1668_v9 = vpop.f32.mrf.mxu0  ;;  %1688 = vmatprep.mubr.msk.f32.mxu1 %vm98_vm0, %v926_v7 }
 0x1b3   :  { %vm896_vm2 = vcmp.ge.f32.partialorder %v866_v6, 0.0  ;;  %v912_v12 = vmul.f32 0.01, %v866_v6  ;;  %v881_v13 = vadd.f32 %v1668_v9, %v2135_v11  ;;  %1689 = vmatmul.mubr.msk.f32.gmra.mxu1 %vm98_vm0, %v927_v10  ;;  %v929_v17 = vsel %vm897_vm15, %v871_v3, %v913_v8 }
 0x1b4   :  { %v875_v4 = vpop.f32.mrf.mxu0 }
 0x1b5   :  { %v876_v14 = vadd.f32 %v2135_v11, %v875_v4  ;;  %v928_v15 = vsel %vm896_vm2, %v866_v6, %v912_v12  ;;  %v915_v16 = vmul.f32 0.01, %v881_v13  ;;  %vm899_vm3 = vcmp.ge.f32.partialorder %v881_v13, 0.0 }
 0x1b6   :  { %1691 = vmatprep.mubr.msk.f32.mxu1 %vm98_vm0, %v928_v15  ;;  %v18_v11 = vstv %s2370_s12 }
 0x1b7   :  { %vm898_vm4 = vcmp.ge.f32.partialorder %v876_v14, 0.0  ;;  %v914_v18 = vmul.f32 0.01, %v876_v14  ;;  %1692 = vmatmul.mubr.msk.f32.gmra.mxu1 %vm98_vm0, %v929_v17  ;;  %v931_v20 = vsel %vm899_vm3, %v881_v13, %v915_v16  ;;  %19 = vst [vmem:[#allocation2] sm:$0x1] %v18_v11 }
 0x1b9   :  { %v930_v19 = vsel %vm898_vm4, %v876_v14, %v914_v18 }
 0x1ba   :  { %1694 = vmatprep.mubr.msk.f32.mxu1 %vm98_vm0, %v930_v19 }
 0x1bb   :  { %1695 = vmatmul.mubr.msk.f32.gmra.mxu1 %vm98_vm0, %v931_v20 }
 0x25e   :  { %v1675_v22 = vpop.f32.mrf.mxu1 }
 0x25f   :  { %v1061_v23 = vadd.f32 %v1675_v22, %v2175_v21 }
 0x260   :  { %v1055_v24 = vpop.f32.mrf.mxu1 }
 0x261   :  { %vm1135_vm5 = vcmp.ge.f32.partialorder %v1061_v23, 0.0  ;;  %v1151_v25 = vmul.f32 0.01, %v1061_v23  ;;  %v1056_v26 = vadd.f32 %v2175_v21, %v1055_v24 }
 0x263   :  { %vm1134_vm1 = vcmp.ge.f32.partialorder %v1056_v26, 0.0  ;;  %v1150_v28 = vmul.f32 0.01, %v1056_v26  ;;  %v1678_v29 = vpop.f32.mrf.mxu1  ;;  %v1167_v30 = vsel %vm1135_vm5, %v1061_v23, %v1151_v25 }
 0x264   :  { %v1071_v31 = vadd.f32 %v1678_v29, %v2175_v21  ;;  %v1190_v32 = vmul.f32 %v2182_v27, %v1167_v30 }
 0x265   :  { %v1065_v33 = vpop.f32.mrf.mxu1  ;;  %v1166_v34 = vsel %vm1134_vm1, %v1056_v26, %v1150_v28 }
 0x266   :  { %vm1137_vm6 = vcmp.ge.f32.partialorder %v1071_v31, 0.0  ;;  %v1153_v35 = vmul.f32 0.01, %v1071_v31  ;;  %v1066_v36 = vadd.f32 %v2175_v21, %v1065_v33  ;;  %v1208_v37 = vsel %vm98_vm0, %v1190_v32, 0.0 }
 0x267   :  { %v1681_v38 = vpop.f32.mrf.mxu1  ;;  %1209 = vadd.xlane.f32.xlu1 %v1208_v37  ;;  %v1189_v39 = vmul.f32 %v2182_v27, %v1166_v34 }
 0x268   :  { %vm1136_vm7 = vcmp.ge.f32.partialorder %v1066_v36, 0.0  ;;  %v1152_v40 = vmul.f32 0.01, %v1066_v36  ;;  %v1081_v41 = vadd.f32 %v1681_v38, %v2175_v21  ;;  %v1169_v42 = vsel %vm1137_vm6, %v1071_v31, %v1153_v35 }
 0x269   :  { %v1075_v43 = vpop.f32.mrf.mxu1  ;;  %v1205_v44 = vsel %vm98_vm0, %v1189_v39, 0.0  ;;  %v1192_v45 = vmul.f32 %v2182_v27, %v1169_v42 }
 0x26a   :  { %v1155_v46 = vmul.f32 0.01, %v1081_v41  ;;  %v1076_v47 = vadd.f32 %v2175_v21, %v1075_v43  ;;  %1206 = vadd.xlane.f32.xlu0 %v1205_v44  ;;  %v1168_v48 = vsel %vm1136_vm7, %v1066_v36, %v1152_v40  ;;  %vm1139_vm8 = vcmp.ge.f32.partialorder %v1081_v41, 0.0 }
 0x26b   :  { %v1684_v49 = vpop.f32.mrf.mxu1  ;;  %v1214_v53 = vsel %vm98_vm0, %v1192_v45, 0.0  ;;  %v1191_v54 = vmul.f32 %v2182_v27, %v1168_v48 }
 0x26c   :  { %vm1138_vm9 = vcmp.ge.f32.partialorder %v1076_v47, 0.0  ;;  %v1154_v50 = vmul.f32 0.01, %v1076_v47  ;;  %v1091_v51 = vadd.f32 %v1684_v49, %v2175_v21  ;;  %v1171_v58 = vsel %vm1139_vm8, %v1081_v41, %v1155_v46 }
 0x26d   :  { %v1085_v52 = vpop.f32.mrf.mxu1  ;;  %v1211_v1 = vsel %vm98_vm0, %v1191_v54, 0.0  ;;  %v1194_v2 = vmul.f32 %v2182_v27, %v1171_v58 }
 0x26e   :  { %v1157_v55 = vmul.f32 0.01, %v1091_v51  ;;  %v1086_v56 = vadd.f32 %v2175_v21, %v1085_v52  ;;  %1215 = vadd.xlane.f32.xlu0 %v1214_v53  ;;  %v1170_v57 = vsel %vm1138_vm9, %v1076_v47, %v1154_v50  ;;  %vm1141_vm10 = vcmp.ge.f32.partialorder %v1091_v51, 0.0 }
 0x26f   :  { %v1687_v59 = vpop.f32.mrf.mxu1  ;;  %v1193_v60 = vmul.f32 %v2182_v27, %v1170_v57  ;;  %v1220_v14 = vsel %vm98_vm0, %v1194_v2, 0.0 }
 0x270   :  { %vm1140_vm11 = vcmp.ge.f32.partialorder %v1086_v56, 0.0  ;;  %v1156_v61 = vmul.f32 0.01, %v1086_v56  ;;  %v1101_v62 = vadd.f32 %v1687_v59, %v2175_v21  ;;  %v1173_v7 = vsel %vm1141_vm10, %v1091_v51, %v1157_v55  ;;  %v1764_v59 = vld [vmem:[%s2364_s2 + $0x8] sm:$0xff] }
 0x271   :  { %v1095_v63 = vpop.f32.mrf.mxu1  ;;  %v1217_v0 = vsel %vm98_vm0, %v1193_v60, 0.0  ;;  %v1196_v15 = vmul.f32 %v2182_v27, %v1173_v7 }
 0x272   :  { %v1159_v3 = vmul.f32 0.01, %v1101_v62  ;;  %v1096_v5 = vadd.f32 %v2175_v21, %v1095_v63  ;;  %1218 = vadd.xlane.f32.xlu1 %v1217_v0  ;;  %1212 = vadd.xlane.f32.xlu0 %v1211_v1  ;;  %v1172_v6 = vsel %vm1140_vm11, %v1086_v56, %v1156_v61  ;;  %vm1143_vm12 = vcmp.ge.f32.partialorder %v1101_v62, 0.0  ;;  %v2230_v56 = vld [vmem:[#allocation2] ss:$0 sm:$0xff] }
 0x273   :  { %v1690_v8 = vpop.f32.mrf.mxu1  ;;  %v1195_v9 = vmul.f32 %v2182_v27, %v1172_v6  ;;  %v1226_v26 = vsel %vm98_vm0, %v1196_v15, 0.0 }
 0x274   :  { %vm1142_vm13 = vcmp.ge.f32.partialorder %v1096_v5, 0.0  ;;  %v1158_v10 = vmul.f32 0.01, %v1096_v5  ;;  %v1111_v12 = vadd.f32 %v1690_v8, %v2175_v21  ;;  %v1175_v19 = vsel %vm1143_vm12, %v1101_v62, %v1159_v3 }
 0x275   :  { %v1105_v13 = vpop.f32.mrf.mxu1  ;;  %v1223_v4 = vsel %vm98_vm0, %v1195_v9, 0.0  ;;  %v1198_v28 = vmul.f32 %v2182_v27, %v1175_v19 }
 0x276   :  { %v1161_v16 = vmul.f32 0.01, %v1111_v12  ;;  %v1106_v17 = vadd.f32 %v2175_v21, %v1105_v13  ;;  %1224 = vadd.xlane.f32.xlu1 %v1223_v4  ;;  %1221 = vadd.xlane.f32.xlu0 %v1220_v14  ;;  %v1174_v18 = vsel %vm1142_vm13, %v1096_v5, %v1158_v10  ;;  %vm1145_vm14 = vcmp.ge.f32.partialorder %v1111_v12, 0.0  ;;  %v1766_v5 = vld [vmem:[%s2364_s2 + $0x18] sm:$0xff]  ;;  %v1767_v13 = vld [vmem:[%s2364_s2 + $0x20] sm:$0xff]  ;;  %v1768_v14 = vld [vmem:[%s2364_s2 + $0x10] sm:$0xff] }
 0x277   :  { %v1693_v20 = vpop.f32.mrf.mxu1  ;;  %v1197_v11 = vmul.f32 %v2182_v27, %v1174_v18  ;;  %v1232_v39 = vsel %vm98_vm0, %v1198_v28, 0.0 }
 0x278   :  { %vm1144_vm15 = vcmp.ge.f32.partialorder %v1106_v17, 0.0  ;;  %v1160_v22 = vmul.f32 0.01, %v1106_v17  ;;  %v1121_v23 = vadd.f32 %v1693_v20, %v2175_v21  ;;  %v1177_v32 = vsel %vm1145_vm14, %v1111_v12, %v1161_v16 }
 0x279   :  { %v1115_v24 = vpop.f32.mrf.mxu1  ;;  %v1229_v25 = vsel %vm98_vm0, %v1197_v11, 0.0  ;;  %v1200_v40 = vmul.f32 %v2182_v27, %v1177_v32 }
 0x27a   :  { %v1163_v29 = vmul.f32 0.01, %v1121_v23  ;;  %v1116_v30 = vadd.f32 %v2175_v21, %v1115_v24  ;;  %1230 = vadd.xlane.f32.xlu1 %v1229_v25  ;;  %1227 = vadd.xlane.f32.xlu0 %v1226_v26  ;;  %v1176_v31 = vsel %vm1144_vm15, %v1106_v17, %v1160_v22  ;;  %vm1147_vm2 = vcmp.ge.f32.partialorder %v1121_v23, 0.0  ;;  %v1769_v22 = vld [vmem:[%s2364_s2 + $0x30] sm:$0xff]  ;;  %v1770_v24 = vld [vmem:[%s2364_s2 + $0x28] sm:$0xff] }
 0x27b   :  { %v1696_v33 = vpop.f32.mrf.mxu1  ;;  %v1199_v34 = vmul.f32 %v2182_v27, %v1176_v31  ;;  %v1238_v48 = vsel %vm98_vm0, %v1200_v40, 0.0 }
 0x27c   :  { %vm1146_vm3 = vcmp.ge.f32.partialorder %v1116_v30, 0.0  ;;  %v1162_v35 = vmul.f32 0.01, %v1116_v30  ;;  %v1131_v36 = vadd.f32 %v1696_v33, %v2175_v21  ;;  %v1179_v44 = vsel %vm1147_vm2, %v1121_v23, %v1163_v29 }
 0x27d   :  { %v1125_v37 = vpop.f32.mrf.mxu1  ;;  %v1235_v38 = vsel %vm98_vm0, %v1199_v34, 0.0  ;;  %v1202_v49 = vmul.f32 %v2182_v27, %v1179_v44 }
 0x27e   :  { %v1165_v41 = vmul.f32 0.01, %v1131_v36  ;;  %v1126_v42 = vadd.f32 %v2175_v21, %v1125_v37  ;;  %1236 = vadd.xlane.f32.xlu1 %v1235_v38  ;;  %1233 = vadd.xlane.f32.xlu0 %v1232_v39  ;;  %v1178_v43 = vsel %vm1146_vm3, %v1116_v30, %v1162_v35  ;;  %vm1149_vm4 = vcmp.ge.f32.partialorder %v1131_v36, 0.0  ;;  %v1771_v35 = vld [vmem:[%s2364_s2 + $0x40] sm:$0xff]  ;;  %v1772_v37 = vld [vmem:[%s2364_s2 + $0x38] sm:$0xff] }
 0x27f   :  { %v1201_v45 = vmul.f32 %v2182_v27, %v1178_v43  ;;  %v1244_v53 = vsel %vm98_vm0, %v1202_v49, 0.0 }
 0x280   :  { %vm1148_vm5 = vcmp.ge.f32.partialorder %v1126_v42, 0.0  ;;  %v1164_v46 = vmul.f32 0.01, %v1126_v42  ;;  %v1181_v51 = vsel %vm1149_vm4, %v1131_v36, %v1165_v41 }
 0x281   :  { %v1241_v47 = vsel %vm98_vm0, %v1201_v45, 0.0  ;;  %v1204_v54 = vmul.f32 %v2182_v27, %v1181_v51 }
 0x282   :  { %1242 = vadd.xlane.f32.xlu1 %v1241_v47  ;;  %1239 = vadd.xlane.f32.xlu0 %v1238_v48  ;;  %v1180_v50 = vsel %vm1148_vm5, %v1126_v42, %v1164_v46  ;;  %v1773_v48 = vld [vmem:[%s2364_s2 + $0x50] sm:$0xff] }
 0x283   :  { %v1203_v21 = vmul.f32 %v2182_v27, %v1180_v50  ;;  %v1250_v55 = vsel %vm98_vm0, %v1204_v54, 0.0  ;;  %v1765_v27 = vld [vmem:[%s2364_s2] sm:$0xff]  ;;  %v1774_v50 = vld [vmem:[%s2364_s2 + $0x48] sm:$0xff] }
 0x285   :  { %v1247_v52 = vsel %vm98_vm0, %v1203_v21, 0.0  ;;  %vm1388_vm0 = vcmask 7168  }
 0x286   :  { %1248 = vadd.xlane.f32.xlu1 %v1247_v52  ;;  %1245 = vadd.xlane.f32.xlu0 %v1244_v53 }
 0x28a   :  { %1251 = vadd.xlane.f32.xlu0 %v1250_v55 }
 0x2f0   :  { %v1210_v57 = vpop.xlane.xlu1 %1209 }
 0x2f1   :  { %v1261_v58 = vadd.f32 %v2230_v56, %v1210_v57 }
 0x2f3   :  { %v1277_v60 = vadd.f32 %v1764_v59, %v1261_v58  ;;  %v1207_v61 = vpop.xlane.xlu0 %1206  ;;  %v1775_v59 = vld [vmem:[%s2364_s2 + $0x60] sm:$0xff] }
 0x2f4   :  { %v1260_v62 = vadd.f32 %v2230_v56, %v1207_v61  ;;  %v1776_v61 = vld [vmem:[%s2364_s2 + $0x58] sm:$0xff] }
 0x2f5   :  { %v1480_v63 = vmul.f32 -1.442695, %v1277_v60 }
 0x2f6   :  { %v1276_v0 = vadd.f32 %v1765_v27, %v1260_v62 }
 0x2f7   :  { %1700 = vpow2.f32 %v1480_v63  ;;  %v1216_v1 = vpop.xlane.xlu0 %1215 }
 0x2f8   :  { %v1479_v2 = vmul.f32 -1.442695, %v1276_v0  ;;  %v1263_v3 = vadd.f32 %v2230_v56, %v1216_v1 }
 0x2fa   :  { %1702 = vpow2.f32 %v1479_v2  ;;  %v1279_v6 = vadd.f32 %v1766_v5, %v1263_v3 }
 0x2fb   :  { %v1219_v7 = vpop.xlane.xlu1 %1218  ;;  %v1213_v8 = vpop.xlane.xlu0 %1212 }
 0x2fc   :  { %v1482_v9 = vmul.f32 -1.442695, %v1279_v6  ;;  %v1264_v10 = vadd.f32 %v2230_v56, %v1219_v7  ;;  %v1262_v12 = vadd.f32 %v2230_v56, %v1213_v8 }
 0x2fe   :  { %1704 = vpow2.f32 %v1482_v9  ;;  %v1280_v4 = vadd.f32 %v1767_v13, %v1264_v10  ;;  %v1278_v15 = vadd.f32 %v1768_v14, %v1262_v12  ;;  %v1777_v10 = vld [vmem:[%s2364_s2 + $0x70] sm:$0xff]  ;;  %v1778_v13 = vld [vmem:[%s2364_s2 + $0x68] sm:$0xff] }
 0x2ff   :  { %v1225_v16 = vpop.xlane.xlu1 %1224  ;;  %v1222_v17 = vpop.xlane.xlu0 %1221 }
 0x300   :  { %v1483_v18 = vmul.f32 -1.442695, %v1280_v4  ;;  %v1481_v19 = vmul.f32 -1.442695, %v1278_v15  ;;  %v1266_v20 = vadd.f32 %v2230_v56, %v1225_v16  ;;  %v1265_v11 = vadd.f32 %v2230_v56, %v1222_v17 }
 0x302   :  { %1706 = vpow2.f32 %v1483_v18  ;;  %v1282_v23 = vadd.f32 %v1769_v22, %v1266_v20  ;;  %v1281_v25 = vadd.f32 %v1770_v24, %v1265_v11  ;;  %v1779_v22 = vld [vmem:[%s2364_s2 + $0x78] sm:$0xff] }
 0x303   :  { %1708 = vpow2.f32 %v1481_v19  ;;  %v1231_v26 = vpop.xlane.xlu1 %1230  ;;  %v1228_v28 = vpop.xlane.xlu0 %1227 }
 0x304   :  { %v1701_v29 = vpop.eup %1700  ;;  %v1485_v30 = vmul.f32 -1.442695, %v1282_v23  ;;  %v1484_v31 = vmul.f32 -1.442695, %v1281_v25  ;;  %v1268_v32 = vadd.f32 %v2230_v56, %v1231_v26  ;;  %v1267_v33 = vadd.f32 %v2230_v56, %v1228_v28 }
 0x305   :  { %v1341_v34 = vadd.f32 1.0, %v1701_v29 }
 0x306   :  { %1710 = vpow2.f32 %v1485_v30  ;;  %v1284_v36 = vadd.f32 %v1771_v35, %v1268_v32  ;;  %v1283_v38 = vadd.f32 %v1772_v37, %v1267_v33 }
 0x307   :  { %v1703_v39 = vpop.eup %1702  ;;  %1712 = vrcp.f32 %v1341_v34  ;;  %v1237_v40 = vpop.xlane.xlu1 %1236 }
 0x308   :  { %v1234_v41 = vpop.xlane.xlu0 %1233  ;;  %v1340_v42 = vadd.f32 1.0, %v1703_v39  ;;  %1714 = vpow2.f32 %v1484_v31  ;;  %v1487_v43 = vmul.f32 -1.442695, %v1284_v36  ;;  %v1486_v44 = vmul.f32 -1.442695, %v1283_v38 }
 0x309   :  { %v1270_v45 = vadd.f32 %v2230_v56, %v1237_v40  ;;  %v1269_v46 = vadd.f32 %v2230_v56, %v1234_v41 }
 0x30a   :  { %1716 = vrcp.f32 %v1340_v42 }
 0x30b   :  { %v1705_v47 = vpop.eup %1704  ;;  %1718 = vpow2.f32 %v1487_v43  ;;  %v1286_v49 = vadd.f32 %v1773_v48, %v1270_v45  ;;  %v1285_v51 = vadd.f32 %v1774_v50, %v1269_v46  ;;  %v1243_v21 = vpop.xlane.xlu1 %1242 }
 0x30c   :  { %v1240_v52 = vpop.xlane.xlu0 %1239  ;;  %v1343_v53 = vadd.f32 1.0, %v1705_v47  ;;  %1720 = vpow2.f32 %v1486_v44  ;;  %v1272_v54 = vadd.f32 %v2230_v56, %v1243_v21 }
 0x30d   :  { %v1271_v55 = vadd.f32 %v2230_v56, %v1240_v52  ;;  %v1489_v57 = vmul.f32 -1.442695, %v1286_v49  ;;  %v1488_v58 = vmul.f32 -1.442695, %v1285_v51 }
 0x30e   :  { %1722 = vrcp.f32 %v1343_v53  ;;  %v1288_v60 = vadd.f32 %v1775_v59, %v1272_v54 }
 0x30f   :  { %v1287_v62 = vadd.f32 %v1776_v61, %v1271_v55  ;;  %v1707_v63 = vpop.eup %1706  ;;  %1724 = vpow2.f32 %v1489_v57  ;;  %v1249_v27 = vpop.xlane.xlu1 %1248 }
 0x310   :  { %v1246_v0 = vpop.xlane.xlu0 %1245  ;;  %v1709_v1 = vpop.eup %1708  ;;  %v1344_v2 = vadd.f32 1.0, %v1707_v63  ;;  %1726 = vpow2.f32 %v1488_v58  ;;  %v1491_v3 = vmul.f32 -1.442695, %v1288_v60  ;;  %v1274_v7 = vadd.f32 %v2230_v56, %v1249_v27 }
 0x311   :  { %v1342_v5 = vadd.f32 1.0, %v1709_v1  ;;  %v1490_v6 = vmul.f32 -1.442695, %v1287_v62  ;;  %v1273_v8 = vadd.f32 %v2230_v56, %v1246_v0 }
 0x312   :  { %1728 = vrcp.f32 %v1344_v2  ;;  %v1290_v12 = vadd.f32 %v1777_v10, %v1274_v7 }
 0x313   :  { %v1711_v9 = vpop.eup %1710  ;;  %1730 = vrcp.f32 %v1342_v5  ;;  %v1289_v4 = vadd.f32 %v1778_v13, %v1273_v8 }
 0x314   :  { %v1252_v14 = vpop.xlane.xlu0 %1251  ;;  %v1713_v15 = vpop.eup %1712  ;;  %v1346_v16 = vadd.f32 1.0, %v1711_v9  ;;  %1732 = vpow2.f32 %v1491_v3  ;;  %v1493_v19 = vmul.f32 -1.442695, %v1290_v12 }
 0x315   :  { %v1275_v17 = vadd.f32 %v2230_v56, %v1252_v14  ;;  %v1715_v18 = vpop.eup %1714  ;;  %1390 = vst.msk [vmem:[%s2373_s13 + $0x8] sm:$0xff] %vm1388_vm0, %v1713_v15  ;;  %1734 = vpow2.f32 %v1490_v6  ;;  %v1492_v20 = vmul.f32 -1.442695, %v1289_v4 }
 0x316   :  { %1736 = vrcp.f32 %v1346_v16  ;;  %v1345_v11 = vadd.f32 1.0, %v1715_v18 }
 0x317   :  { %v1291_v23 = vadd.f32 %v1779_v22, %v1275_v17  ;;  %v1717_v24 = vpop.eup %1716  ;;  %1738 = vpow2.f32 %v1493_v19 }
 0x318   :  { %v1719_v25 = vpop.eup %1718  ;;  %1389 = vst.msk [vmem:[%s2373_s13] sm:$0xff] %vm1388_vm0, %v1717_v24  ;;  %1740 = vrcp.f32 %v1345_v11 }
 0x319   :  { %v1494_v56 = vmul.f32 -1.442695, %v1291_v23  ;;  %v1721_v26 = vpop.eup %1720  ;;  %v1348_v28 = vadd.f32 1.0, %v1719_v25  ;;  %1742 = vpow2.f32 %v1492_v20 }
 0x31a   :  { %v1347_v29 = vadd.f32 1.0, %v1721_v26 }
 0x31b   :  { %1744 = vpow2.f32 %v1494_v56  ;;  %v1723_v30 = vpop.eup %1722 }
 0x31c   :  { %1746 = vrcp.f32 %v1348_v28  ;;  %v1725_v31 = vpop.eup %1724  ;;  %1392 = vst.msk [vmem:[%s2373_s13 + $0x18] sm:$0xff] %vm1388_vm0, %v1723_v30 }
 0x31d   :  { %1748 = vrcp.f32 %v1347_v29  ;;  %v1727_v32 = vpop.eup %1726  ;;  %v1350_v33 = vadd.f32 1.0, %v1725_v31 }
 0x31e   :  { %v1349_v34 = vadd.f32 1.0, %v1727_v32 }
 0x31f   :  { %v1729_v35 = vpop.eup %1728  ;;  %1750 = vrcp.f32 %v1350_v33 }
 0x320   :  { %v1731_v36 = vpop.eup %1730  ;;  %1393 = vst.msk [vmem:[%s2373_s13 + $0x20] sm:$0xff] %vm1388_vm0, %v1729_v35  ;;  %1752 = vrcp.f32 %v1349_v34 }
 0x321   :  { %v1733_v37 = vpop.eup %1732  ;;  %1391 = vst.msk [vmem:[%s2373_s13 + $0x10] sm:$0xff] %vm1388_vm0, %v1731_v36 }
 0x322   :  { %v1735_v38 = vpop.eup %1734  ;;  %v1352_v39 = vadd.f32 1.0, %v1733_v37 }
 0x323   :  { %v1737_v40 = vpop.eup %1736  ;;  %v1351_v41 = vadd.f32 1.0, %v1735_v38 }
 0x324   :  { %v1739_v42 = vpop.eup %1738  ;;  %1395 = vst.msk [vmem:[%s2373_s13 + $0x30] sm:$0xff] %vm1388_vm0, %v1737_v40  ;;  %1754 = vrcp.f32 %v1352_v39 }
 0x325   :  { %v1741_v43 = vpop.eup %1740  ;;  %1756 = vrcp.f32 %v1351_v41  ;;  %v1354_v44 = vadd.f32 1.0, %v1739_v42 }
 0x326   :  { %v1743_v45 = vpop.eup %1742  ;;  %1394 = vst.msk [vmem:[%s2373_s13 + $0x28] sm:$0xff] %vm1388_vm0, %v1741_v43 }
 0x327   :  { %1758 = vrcp.f32 %v1354_v44  ;;  %v1353_v47 = vadd.f32 1.0, %v1743_v45 }
 0x328   :  { %v1745_v46 = vpop.eup %1744 }
 0x329   :  { %v1747_v48 = vpop.eup %1746  ;;  %v1355_v49 = vadd.f32 1.0, %v1745_v46  ;;  %1760 = vrcp.f32 %v1353_v47 }
 0x32a   :  { %v1749_v50 = vpop.eup %1748  ;;  %1397 = vst.msk [vmem:[%s2373_s13 + $0x40] sm:$0xff] %vm1388_vm0, %v1747_v48 }
 0x32b   :  { %1396 = vst.msk [vmem:[%s2373_s13 + $0x38] sm:$0xff] %vm1388_vm0, %v1749_v50  ;;  %1762 = vrcp.f32 %v1355_v49 }
 0x32c   :  { %v1751_v51 = vpop.eup %1750 }
 0x32d   :  { %v1753_v21 = vpop.eup %1752  ;;  %1399 = vst.msk [vmem:[%s2373_s13 + $0x50] sm:$0xff] %vm1388_vm0, %v1751_v51 }
 0x32e   :  { %1398 = vst.msk [vmem:[%s2373_s13 + $0x48] sm:$0xff] %vm1388_vm0, %v1753_v21 }
 0x331   :  { %v1755_v52 = vpop.eup %1754 }
 0x332   :  { %v1757_v53 = vpop.eup %1756  ;;  %1401 = vst.msk [vmem:[%s2373_s13 + $0x60] sm:$0xff] %vm1388_vm0, %v1755_v52 }
 0x333   :  { %1400 = vst.msk [vmem:[%s2373_s13 + $0x58] sm:$0xff] %vm1388_vm0, %v1757_v53 }
 0x334   :  { %v1759_v54 = vpop.eup %1758 }
 0x335   :  { %1403 = vst.msk [vmem:[%s2373_s13 + $0x70] sm:$0xff] %vm1388_vm0, %v1759_v54 }
 0x336   :  { %v1761_v55 = vpop.eup %1760 }
 0x337   :  { %1402 = vst.msk [vmem:[%s2373_s13 + $0x68] sm:$0xff] %vm1388_vm0, %v1761_v55 }
 0x338   :  { %v1763_v57 = vpop.eup %1762 }
 0x339   :  { %1404 = vst.msk [vmem:[%s2373_s13 + $0x78] sm:$0xff] %vm1388_vm0, %v1763_v57 }

</bundles_post_ra>
